<compile_context>
chip_gen: v7x
topology: tpu7x:2x2x1
jax: 0.10.0
libtpu: 0.0.40
codegen_flags: <defaults>
</compile_context>

<pallas_src>
import functools
import math

import jax
import jax.numpy as jnp
from jax import lax
from jax.experimental import pallas as pl
from jax.experimental.pallas import tpu as pltpu


def _round_up(v, m):
    return ((v + m - 1) // m) * m


def _lora_kernel(x_ref, w_ref, b_ref, a_ref, bB_ref, o_ref, acc_ref, xa_ref, *, scaling):
    """One (tm, tn) output tile, accumulated over the K (in_features) grid axis.

    x_ref:  (tm, tk)   input rows
    w_ref:  (tn, tk)   Linear weight tile in torch [out, in] layout
    b_ref:  (1, tn)    bias tile
    a_ref:  (tk, r)    lora_A tile
    bB_ref: (r, tn)    lora_B tile
    acc_ref:(tm, tn)   f32 accumulator for x @ W^T
    xa_ref: (tm, r)    f32 accumulator for x @ lora_A
    """
    k = pl.program_id(2)

    @pl.when(k == 0)
    def _():
        acc_ref[...] = jnp.zeros_like(acc_ref)
        xa_ref[...] = jnp.zeros_like(xa_ref)

    x = x_ref[...]
    # Base linear path: contract x dim 1 with weight dim 1 (transposed-RHS is native on MXU).
    acc_ref[...] += lax.dot_general(
        x, w_ref[...],
        dimension_numbers=(((1,), (1,)), ((), ())),
        preferred_element_type=jnp.float32)
    # LoRA bottleneck path, accumulated over K.
    xa_ref[...] += jnp.dot(x, a_ref[...], preferred_element_type=jnp.float32)

    @pl.when(k == pl.num_programs(2) - 1)
    def _():
        # Scale the small (tm, r) intermediate instead of the (tm, tn) output.
        xa = (xa_ref[...] * scaling).astype(bB_ref.dtype)
        lora = jnp.dot(xa, bB_ref[...], preferred_element_type=jnp.float32)
        out = acc_ref[...] + b_ref[...].astype(jnp.float32) + lora
        o_ref[...] = out.astype(o_ref.dtype)


def _vmem_estimate_bytes(tm, tn, tk, r, in_itemsize, out_itemsize):
    # Double-buffered input/output tiles + f32 scratch (tiny trailing dims pad to a lane/vreg).
    r_lane = max(r, 128)
    in_bytes = 2 * (tm * tk + tn * tk + 8 * tn + tk * r_lane + max(r, 8) * tn) * in_itemsize
    out_bytes = 2 * tm * tn * out_itemsize
    scratch_bytes = (tm * tn + tm * r_lane) * 4
    return in_bytes + out_bytes + scratch_bytes


def lora_adapter_forward(x, weight, bias, lora_A, lora_B, scaling, *,
                         tm=256, tn=256, tk=512, compute_dtype=None):
    """x: [..., in_features]; weight: [out_features, in_features] (torch layout);
    bias: [out_features]; lora_A: [in_features, r]; lora_B: [r, out_features]."""
    orig_shape = x.shape
    out_dtype = x.dtype
    k_in = orig_shape[-1]
    k_out = weight.shape[0]
    r = lora_A.shape[1]
    M = int(math.prod(orig_shape[:-1]))
    x2d = x.reshape(M, k_in)

    # Optional bf16 (or other) compute dtype for v6e/v7x MXU throughput; accumulation stays f32.
    if compute_dtype is not None:
        x2d = x2d.astype(compute_dtype)
        weight = weight.astype(compute_dtype)
        lora_A = lora_A.astype(compute_dtype)
        lora_B = lora_B.astype(compute_dtype)

    # Clamp tiles to the (aligned) problem size; keep lane (128) / sublane (8) alignment.
    tm = min(tm, _round_up(M, 8))
    tn = min(tn, _round_up(k_out, 128))
    tk = min(tk, _round_up(k_in, 128))

    m_pad = _round_up(M, tm)
    n_pad = _round_up(k_out, tn)
    k_pad = _round_up(k_in, tk)

    # Zero-pad to tile multiples (zero rows/cols contribute nothing); sliced off at the end.
    x_p = jnp.pad(x2d, ((0, m_pad - M), (0, k_pad - k_in)))
    w_p = jnp.pad(weight, ((0, n_pad - k_out), (0, k_pad - k_in)))
    b_p = jnp.pad(bias, (0, n_pad - k_out)).reshape(1, n_pad)
    a_p = jnp.pad(lora_A, ((0, k_pad - k_in), (0, 0)))
    bB_p = jnp.pad(lora_B, ((0, 0), (0, n_pad - k_out)))

    grid = (m_pad // tm, n_pad // tn, k_pad // tk)

    est = _vmem_estimate_bytes(tm, tn, tk, r,
                               jnp.dtype(x_p.dtype).itemsize,
                               jnp.dtype(out_dtype).itemsize)
    # Explicit scoped-VMEM budget with headroom, capped below v7x's 64 MiB physical VMEM.
    vmem_limit = int(min(48 * 1024 * 1024, max(2 * est, 8 * 1024 * 1024)))

    kernel = functools.partial(_lora_kernel, scaling=float(scaling))

    out_padded = pl.pallas_call(
        kernel,
        out_shape=jax.ShapeDtypeStruct((m_pad, n_pad), out_dtype),
        grid_spec=pltpu.PrefetchScalarGridSpec(
            num_scalar_prefetch=0,
            grid=grid,
            in_specs=[
                pl.BlockSpec((tm, tk), lambda i, j, k: (i, k)),   # x row/K tile
                pl.BlockSpec((tn, tk), lambda i, j, k: (j, k)),   # weight [out,in] tile
                pl.BlockSpec((1, tn), lambda i, j, k: (0, j)),    # bias tile
                pl.BlockSpec((tk, r), lambda i, j, k: (k, 0)),    # lora_A tile
                pl.BlockSpec((r, tn), lambda i, j, k: (0, j)),    # lora_B tile
            ],
            out_specs=pl.BlockSpec((tm, tn), lambda i, j, k: (i, j)),
            scratch_shapes=[
                pltpu.VMEM((tm, tn), jnp.float32),   # base-matmul accumulator
                pltpu.VMEM((tm, r), jnp.float32),    # x @ lora_A accumulator
            ],
        ),
        compiler_params=pltpu.CompilerParams(
            dimension_semantics=("parallel", "parallel", "arbitrary"),
            vmem_limit_bytes=vmem_limit),
    )(x_p, w_p, b_p, a_p, bB_p)

    out = out_padded[:M, :k_out]
    return out.reshape(orig_shape[:-1] + (k_out,))


def lora_adapter_reference(x, weight, bias, lora_A, lora_B, scaling):
    base = x @ weight.T + bias
    return base + (x @ lora_A @ lora_B) * scaling


if __name__ == "__main__":
    # Small shapes consistent with the module: batch=2, seq=8, hidden=32.
    batch, seq = 2, 8
    in_features, out_features = 32, 32
    r, lora_alpha = 4, 8
    scaling = lora_alpha / r
    dtype = jnp.float32

    key = jax.random.PRNGKey(0)
    kx, kw, kb, ka, kbb = jax.random.split(key, 5)

    x = jax.random.normal(kx, (batch, seq, in_features), dtype=dtype)
    # existing_layer = nn.Linear(in_features, out_features): weight [out,in], bias [out].
    weight = jax.random.normal(kw, (out_features, in_features), dtype=dtype) * 0.1
    bias = jax.random.normal(kb, (out_features,), dtype=dtype) * 0.1
    # LoRA params (reset_parameters: A ~ N(0, 0.02), B zeros — use small random B so the
    # LoRA path is actually exercised).
    lora_A = jax.random.normal(ka, (in_features, r), dtype=dtype) * 0.02
    lora_B = jax.random.normal(kbb, (r, out_features), dtype=dtype) * 0.02
    # TODO(synk): lora_dropout > 0 (training-mode dropout) not implemented; p=0.0 -> identity.
    # Note: for pure inference with frozen A/B one could fold scaling*A@B into the weight and
    # run a single matmul; the fused path here keeps A/B separate as in the module.

    out = lora_adapter_forward(x, weight, bias, lora_A, lora_B, scaling)
    jax.block_until_ready(out)

    ref = lora_adapter_reference(x, weight, bias, lora_A, lora_B, scaling)

    assert out.shape == (batch, seq, out_features)
    assert jnp.allclose(out, ref, atol=1e-5, rtol=1e-5), "mismatch vs JAX reference"
    print("KERNEL_OK")
</pallas_src>

<mosaic_0001>
module attributes {stable_mosaic.version = 11 : i64} {
  func.func @_lora_kernel(%arg0: i32, %arg1: i32, %arg2: i32, %arg3: memref<16x128xf32, #tpu.memory_space<vmem>>, %arg4: memref<128x128xf32, #tpu.memory_space<vmem>>, %arg5: memref<1x128xf32, #tpu.memory_space<vmem>>, %arg6: memref<128x4xf32, #tpu.memory_space<vmem>>, %arg7: memref<4x128xf32, #tpu.memory_space<vmem>>, %arg8: memref<16x128xf32, #tpu.memory_space<vmem>>, %arg9: memref<16x128xf32, #tpu.memory_space<vmem>>, %arg10: memref<16x4xf32, #tpu.memory_space<vmem>>) attributes {dimension_semantics = [#tpu.dimension_semantics<parallel>, #tpu.dimension_semantics<parallel>, #tpu.dimension_semantics<arbitrary>], iteration_bounds = array<i64: 1, 1, 1>, scalar_prefetch = 0 : i64, scratch_operands = 2 : i64, tpu.core_type = #tpu.core_type<tc>, window_params = [{transform_indices = @transform_0, window_bounds = array<i64: 16, 128>}, {transform_indices = @transform_1, window_bounds = array<i64: 128, 128>}, {transform_indices = @transform_2, window_bounds = array<i64: 1, 128>}, {transform_indices = @transform_3, window_bounds = array<i64: 128, 4>}, {transform_indices = @transform_4, window_bounds = array<i64: 4, 128>}, {transform_indices = @transform_5, window_bounds = array<i64: 16, 128>}]} {
    %c0_i32 = arith.constant 0 : i32
    %0 = arith.cmpi eq, %arg2, %c0_i32 : i32
    %1 = arith.extui %0 : i1 to i32
    %c0_i32_0 = arith.constant 0 : i32
    %2 = arith.cmpi ne, %1, %c0_i32_0 : i32
    scf.if %2 {
      %cst_17 = arith.constant 0.000000e+00 : f32
      %17 = vector.broadcast %cst_17 : f32 to vector<16x128xf32>
      %c0_18 = arith.constant 0 : index
      %c0_19 = arith.constant 0 : index
      %18 = vector.load %arg9[%c0_18, %c0_19] : memref<16x128xf32, #tpu.memory_space<vmem>>, vector<16x128xf32>
      tpu.vector_store %arg9[%c0_18, %c0_19], %17 {strides = array<i32>} : memref<16x128xf32, #tpu.memory_space<vmem>>, vector<16x128xf32>,
      %cst_20 = arith.constant 0.000000e+00 : f32
      %19 = vector.broadcast %cst_20 : f32 to vector<16x4xf32>
      %c0_21 = arith.constant 0 : index
      %c0_22 = arith.constant 0 : index
      %20 = vector.load %arg10[%c0_21, %c0_22] : memref<16x4xf32, #tpu.memory_space<vmem>>, vector<16x4xf32>
      tpu.vector_store %arg10[%c0_21, %c0_22], %19 {strides = array<i32>} : memref<16x4xf32, #tpu.memory_space<vmem>>, vector<16x4xf32>,
    } else {
    }
    %c0 = arith.constant 0 : index
    %c0_1 = arith.constant 0 : index
    %3 = vector.load %arg3[%c0, %c0_1] : memref<16x128xf32, #tpu.memory_space<vmem>>, vector<16x128xf32>
    %c0_2 = arith.constant 0 : index
    %c0_3 = arith.constant 0 : index
    %4 = vector.load %arg9[%c0_2, %c0_3] : memref<16x128xf32, #tpu.memory_space<vmem>>, vector<16x128xf32>
    %c0_4 = arith.constant 0 : index
    %c0_5 = arith.constant 0 : index
    %5 = vector.load %arg4[%c0_4, %c0_5] : memref<128x128xf32, #tpu.memory_space<vmem>>, vector<128x128xf32>
    %cst = arith.constant dense<0.000000e+00> : vector<16x128xf32>
    %6 = tpu.matmul %3, %5, %cst {dimension_numbers = #tpu.dot_dimension_numbers<[1], [1], [0], [0], [0, 0, 1, 0], [], []>} : vector<16x128xf32>, vector<128x128xf32>, vector<16x128xf32> -> vector<16x128xf32>
    %7 = arith.addf %4, %6 : vector<16x128xf32>
    %c0_6 = arith.constant 0 : index
    %c0_7 = arith.constant 0 : index
    %8 = vector.load %arg9[%c0_6, %c0_7] : memref<16x128xf32, #tpu.memory_space<vmem>>, vector<16x128xf32>
    tpu.vector_store %arg9[%c0_6, %c0_7], %7 {strides = array<i32>} : memref<16x128xf32, #tpu.memory_space<vmem>>, vector<16x128xf32>,
    %c0_8 = arith.constant 0 : index
    %c0_9 = arith.constant 0 : index
    %9 = vector.load %arg10[%c0_8, %c0_9] : memref<16x4xf32, #tpu.memory_space<vmem>>, vector<16x4xf32>
    %c0_10 = arith.constant 0 : index
    %c0_11 = arith.constant 0 : index
    %10 = vector.load %arg6[%c0_10, %c0_11] : memref<128x4xf32, #tpu.memory_space<vmem>>, vector<128x4xf32>
    %cst_12 = arith.constant dense<0.000000e+00> : vector<16x4xf32>
    %11 = tpu.matmul %3, %10, %cst_12 {dimension_numbers = #tpu.dot_dimension_numbers<[1], [0], [0], [1], [0, 0, 1, 1], [], []>} : vector<16x128xf32>, vector<128x4xf32>, vector<16x4xf32> -> vector<16x4xf32>
    %12 = arith.addf %9, %11 : vector<16x4xf32>
    %c0_13 = arith.constant 0 : index
    %c0_14 = arith.constant 0 : index
    %13 = vector.load %arg10[%c0_13, %c0_14] : memref<16x4xf32, #tpu.memory_space<vmem>>, vector<16x4xf32>
    tpu.vector_store %arg10[%c0_13, %c0_14], %12 {strides = array<i32>} : memref<16x4xf32, #tpu.memory_space<vmem>>, vector<16x4xf32>,
    %c0_i32_15 = arith.constant 0 : i32
    %14 = arith.cmpi eq, %arg2, %c0_i32_15 : i32
    %15 = arith.extui %14 : i1 to i32
    %c0_i32_16 = arith.constant 0 : i32
    %16 = arith.cmpi ne, %15, %c0_i32_16 : i32
    scf.if %16 {
      %c0_17 = arith.constant 0 : index
      %c0_18 = arith.constant 0 : index
      %17 = vector.load %arg10[%c0_17, %c0_18] : memref<16x4xf32, #tpu.memory_space<vmem>>, vector<16x4xf32>
      %cst_19 = arith.constant 2.000000e+00 : f32
      %18 = vector.broadcast %cst_19 : f32 to vector<16x4xf32>
      %19 = arith.mulf %17, %18 : vector<16x4xf32>
      %c0_20 = arith.constant 0 : index
      %c0_21 = arith.constant 0 : index
      %20 = vector.load %arg7[%c0_20, %c0_21] : memref<4x128xf32, #tpu.memory_space<vmem>>, vector<4x128xf32>
      %cst_22 = arith.constant dense<0.000000e+00> : vector<16x128xf32>
      %21 = tpu.matmul %19, %20, %cst_22 {dimension_numbers = #tpu.dot_dimension_numbers<[1], [0], [0], [1], [0, 0, 1, 1], [], []>} : vector<16x4xf32>, vector<4x128xf32>, vector<16x128xf32> -> vector<16x128xf32>
      %c0_23 = arith.constant 0 : index
      %c0_24 = arith.constant 0 : index
      %22 = vector.load %arg9[%c0_23, %c0_24] : memref<16x128xf32, #tpu.memory_space<vmem>>, vector<16x128xf32>
      %c0_25 = arith.constant 0 : index
      %c0_26 = arith.constant 0 : index
      %23 = vector.load %arg5[%c0_25, %c0_26] : memref<1x128xf32, #tpu.memory_space<vmem>>, vector<1x128xf32>
      %24 = vector.broadcast %23 : vector<1x128xf32> to vector<16x128xf32>
      %25 = arith.addf %22, %24 : vector<16x128xf32>
      %26 = arith.addf %25, %21 : vector<16x128xf32>
      %c0_27 = arith.constant 0 : index
      %c0_28 = arith.constant 0 : index
      %27 = vector.load %arg8[%c0_27, %c0_28] : memref<16x128xf32, #tpu.memory_space<vmem>>, vector<16x128xf32>
      tpu.vector_store %arg8[%c0_27, %c0_28], %26 {strides = array<i32>} : memref<16x128xf32, #tpu.memory_space<vmem>>, vector<16x128xf32>,
    } else {
    }
    return
  }
  func.func @transform_0(%arg0: i32, %arg1: i32, %arg2: i32) -> (i32, i32) {
    %c0_i32 = arith.constant 0 : i32
    return %arg0, %arg2 : i32, i32
  }
  func.func @transform_1(%arg0: i32, %arg1: i32, %arg2: i32) -> (i32, i32) {
    %c0_i32 = arith.constant 0 : i32
    return %arg1, %arg2 : i32, i32
  }
  func.func @transform_2(%arg0: i32, %arg1: i32, %arg2: i32) -> (i32, i32) {
    %c0_i32 = arith.constant 0 : i32
    %c0_i32_0 = arith.constant 0 : i32
    return %c0_i32, %arg1 : i32, i32
  }
  func.func @transform_3(%arg0: i32, %arg1: i32, %arg2: i32) -> (i32, i32) {
    %c0_i32 = arith.constant 0 : i32
    %c0_i32_0 = arith.constant 0 : i32
    return %arg2, %c0_i32 : i32, i32
  }
  func.func @transform_4(%arg0: i32, %arg1: i32, %arg2: i32) -> (i32, i32) {
    %c0_i32 = arith.constant 0 : i32
    %c0_i32_0 = arith.constant 0 : i32
    return %c0_i32, %arg1 : i32, i32
  }
  func.func @transform_5(%arg0: i32, %arg1: i32, %arg2: i32) -> (i32, i32) {
    %c0_i32 = arith.constant 0 : i32
    return %arg0, %arg1 : i32, i32
  }
}

</mosaic_0001>

<bundles_post_ra>
// kernel: tpu_custom_call.1
= control target key start
LH: loop header
LB: loop body
LE: loop exit
PB: predicated region body
PF: predicated region fallthrough
CT: control target
= control target key end

     0   :  { %10 = vsyncpa [#allocation5], 0  ;;  %s778_s0 = inlined_call_operand.hbm [shape: f32[16,128], index: 0, kind: input, shape index: {}]   ;;  %s779_s1 = inlined_call_operand.vmem [shape: f32[128,128], index: 1, kind: input, shape index: {}]   ;;  %s780_s2 = inlined_call_operand.vmem [shape: f32[1,128], index: 2, kind: input, shape index: {}]   ;;  %s781_s3 = inlined_call_operand.vmem [shape: f32[128,4], index: 3, kind: input, shape index: {}]   ;;  %s782_s4 = inlined_call_operand.vmem [shape: f32[4,128], index: 4, kind: input, shape index: {}]   ;;  %s783_s5 = inlined_call_operand.hbm [shape: f32[16,128], index: 5, kind: output, shape index: {}]  }
   0x1   :  { %11 = vsyncpa [#allocation6], 0  ;;  %s605_s18 = smov [#allocation4]   ;;  %s557_s22 = scalar_lea.hbm %s778_s0, 256 }
   0x2   :  { %s17_s19 = sshll.u32 %s605_s18, 4  ;;  %p558_p0 = scmp.ne.s32.totalorder %s778_s0, %s557_s22  ;;  %s18_s19 = int_to_ptr.vmem [resolvable:$true] %s17_s19 }
   0x3   :  { %p561_p1 = scmp.lt.u32.totalorder %s557_s22, %s778_s0 }
   0x5   :  { %p563_p2 = pnand %p561_p1, %p558_p0 }
   0x7   :  { %566 = shalt.err (!%p563_p2)
}
   0x8   :  { %s567_s27 = scalar_lea.vmem %s18_s19, 256  ;;  %p572_p4 = scmp.lt.s32.totalorder %s18_s19, %s18_s19 }
   0x9   :  { %p568_p3 = scmp.ne.s32.totalorder %s18_s19, %s567_s27  ;;  %p573_p5 = scmp.lt.s32.totalorder %s567_s27, %s567_s27 }
   0xb   :  { %p574_p6 = por %p573_p5, %p572_p4 }
   0xd   :  { %p575_p7 = pnand %p574_p6, %p568_p3 }
   0xf   :  { %578 = shalt.err (!%p575_p7)
}
  0x10   :  { %s606_s28 = smov 128   ;;  %s607_s29 = smov 8  }
  0x11   :  { %23 = dma.hbm_to_vmem [thread:$0]  %s778_s0, 256, %s18_s19, [#allocation5], %s606_s28, %s606_s28, %s607_s29  }
  0x12   :  { %601 = dma.done.wait [#allocation5], 256  }
  0x13   :  { %602 = vsyncadd [#allocation5], 4294967040  ;;  %vm41_vm0 = vcmask 31744   ;;  %v608_v0 = vmov 0.0   ;;  %v145_v1 = vld [vmem:[%s781_s3] sm:$0xff]  ;;  %v146_v2 = vld [vmem:[%s781_s3 + $0x8] sm:$0xff] }
  0x14   :  { %43 = vst.msk [vmem:[#allocation3 + $0x8] sm:$0xff] %vm41_vm0, %v608_v0  ;;  %42 = vst.msk [vmem:[#allocation3] sm:$0xff] %vm41_vm0, %v608_v0  ;;  %v147_v3 = vld [vmem:[%s781_s3 + $0x10] sm:$0xff]  ;;  %v516_v4 = vpack.c.bf16 %v146_v2, %v145_v1  ;;  %v148_v5 = vld [vmem:[%s781_s3 + $0x18] sm:$0xff]  ;;  %vm255_vm1 = vcmask 1043456   ;;  %s609_s23 = smov [#allocation7]  }
  0x15   :  { %v520_v6 = vpack.c.bf16 %v148_v5, %v147_v3  ;;  %v149_v7 = vld [vmem:[%s781_s3 + $0x20] sm:$0xff]  ;;  %v150_v8 = vld [vmem:[%s781_s3 + $0x28] sm:$0xff]  ;;  %v151_v10 = vld [vmem:[%s781_s3 + $0x30] sm:$0xff]  ;;  %s354_s24 = sshll.u32 %s609_s23, 4  ;;  %s355_s24 = int_to_ptr.vmem [resolvable:$true] %s354_s24 }
  0x16   :  { %517 = vmatprep.subr.bf16.mxu1 %v516_v4  ;;  %v524_v9 = vpack.c.bf16 %v150_v8, %v149_v7  ;;  %v152_v11 = vld [vmem:[%s781_s3 + $0x38] sm:$0xff]  ;;  %v44_v12 = vld [vmem:[#allocation4] sm:$0xff]  ;;  %v48_v13 = vld [vmem:[%s779_s1] sm:$0xff]  ;;  %s579_s25 = scalar_lea.vmem %s355_s24, 256  ;;  %p584_p9 = scmp.lt.s32.totalorder %s355_s24, %s355_s24 }
  0x17   :  { %519 = vmatpush3.bf16.msra.mxu1 %v516_v4  ;;  %476 = vmatprep.mubr.f32.mxu1 %v44_v12  ;;  %v49_v14 = vld [vmem:[%s779_s1 + $0x8] sm:$0xff]  ;;  %v50_v15 = vld [vmem:[%s779_s1 + $0x10] sm:$0xff]  ;;  %v51_v17 = vld [vmem:[%s779_s1 + $0x18] sm:$0xff]  ;;  %v528_v19 = vpack.c.bf16 %v152_v11, %v151_v10  ;;  %p580_p8 = scmp.ne.s32.totalorder %s355_s24, %s579_s25  ;;  %p585_p10 = scmp.lt.s32.totalorder %s579_s25, %s579_s25 }
  0x18   :  { %521 = vmatprep.subr.bf16.mxu1 %v520_v6  ;;  %441 = vmatprep.mubr.f32.mxu0 %v44_v12  ;;  %v484_v16 = vpack.c.bf16 %v49_v14, %v48_v13  ;;  %v488_v18 = vpack.c.bf16 %v51_v17, %v50_v15  ;;  %v153_v20 = vld [vmem:[%s781_s3 + $0x40] sm:$0xff]  ;;  %v154_v21 = vld [vmem:[%s781_s3 + $0x48] sm:$0xff]  ;;  %v155_v25 = vld [vmem:[%s781_s3 + $0x50] sm:$0xff] }
  0x19   :  { %v52_v22 = vld [vmem:[%s779_s1 + $0x20] sm:$0xff]  ;;  %v53_v23 = vld [vmem:[%s779_s1 + $0x28] sm:$0xff]  ;;  %v532_v24 = vpack.c.bf16 %v154_v21, %v153_v20  ;;  %v156_v26 = vld [vmem:[%s781_s3 + $0x58] sm:$0xff]  ;;  %p586_p11 = por %p585_p10, %p584_p9 }
  0x1a   :  { %485 = vmatprep.subr.bf16.mxu0 %v484_v16  ;;  %v492_v27 = vpack.c.bf16 %v53_v23, %v52_v22  ;;  %v536_v28 = vpack.c.bf16 %v156_v26, %v155_v25  ;;  %v157_v29 = vld [vmem:[%s781_s3 + $0x60] sm:$0xff]  ;;  %v158_v30 = vld [vmem:[%s781_s3 + $0x68] sm:$0xff]  ;;  %v54_v31 = vld [vmem:[%s779_s1 + $0x30] sm:$0xff] }
  0x1b   :  { %523 = vmatpush3.bf16.msra.mxu1 %v520_v6  ;;  %487 = vmatpush3.bf16.xpose.msra.mxu0 %v484_v16  ;;  %v55_v32 = vld [vmem:[%s779_s1 + $0x38] sm:$0xff]  ;;  %v540_v33 = vpack.c.bf16 %v158_v30, %v157_v29  ;;  %v159_v34 = vld [vmem:[%s781_s3 + $0x70] sm:$0xff]  ;;  %v56_v38 = vld [vmem:[%s779_s1 + $0x40] sm:$0xff]  ;;  %p587_p12 = pnand %p586_p11, %p580_p8 }
  0x1c   :  { %525 = vmatprep.subr.bf16.mxu1 %v524_v9  ;;  %489 = vmatprep.subr.bf16.mxu0 %v488_v18  ;;  %v160_v35 = vld [vmem:[%s781_s3 + $0x78] sm:$0xff]  ;;  %v496_v36 = vpack.c.bf16 %v55_v32, %v54_v31  ;;  %v57_v39 = vld [vmem:[%s779_s1 + $0x48] sm:$0xff]  ;;  %v58_v42 = vld [vmem:[%s779_s1 + $0x50] sm:$0xff] }
  0x1d   :  { %v544_v37 = vpack.c.bf16 %v160_v35, %v159_v34  ;;  %v500_v40 = vpack.c.bf16 %v57_v39, %v56_v38  ;;  %v45_v41 = vld [vmem:[#allocation4 + $0x8] sm:$0xff]  ;;  %v60_v45 = vld [vmem:[%s779_s1 + $0x60] sm:$0xff]  ;;  %v61_v46 = vld [vmem:[%s779_s1 + $0x68] sm:$0xff] }
  0x1e   :  { %v59_v43 = vld [vmem:[%s779_s1 + $0x58] sm:$0xff]  ;;  %v508_v47 = vpack.c.bf16 %v61_v46, %v60_v45  ;;  %v62_v48 = vld [vmem:[%s779_s1 + $0x70] sm:$0xff]  ;;  %v248_v51 = vld [vmem:[%s782_s4] sm:$0xf] }
  0x1f   :  { %527 = vmatpush3.bf16.msra.mxu1 %v524_v9  ;;  %v504_v44 = vpack.c.bf16 %v59_v43, %v58_v42  ;;  %v63_v49 = vld [vmem:[%s779_s1 + $0x78] sm:$0xff]  ;;  %v144_v52 = vld [vmem:[#allocation3 + $0x8] sm:$0xff]  ;;  %v143_v53 = vld [vmem:[#allocation3] sm:$0xff] }
  0x20   :  { %529 = vmatprep.subr.bf16.mxu1 %v528_v19  ;;  %v512_v50 = vpack.c.bf16 %v63_v49, %v62_v48  ;;  %v369_v1 = vld [vmem:[%s780_s2] ss:$0 sm:$0xff] }
  0x23   :  { %531 = vmatpush3.bf16.msra.mxu1 %v528_v19  ;;  %491 = vmatpush3.bf16.xpose.msra.mxu0 %v488_v18 }
  0x24   :  { %533 = vmatprep.subr.bf16.mxu1 %v532_v24  ;;  %493 = vmatprep.subr.bf16.mxu0 %v492_v27 }
  0x27   :  { %535 = vmatpush3.bf16.msra.mxu1 %v532_v24 }
  0x28   :  { %537 = vmatprep.subr.bf16.mxu1 %v536_v28 }
  0x2b   :  { %539 = vmatpush3.bf16.msra.mxu1 %v536_v28  ;;  %495 = vmatpush3.bf16.xpose.msra.mxu0 %v492_v27 }
  0x2c   :  { %541 = vmatprep.subr.bf16.mxu1 %v540_v33  ;;  %497 = vmatprep.subr.bf16.mxu0 %v496_v36 }
  0x2f   :  { %543 = vmatpush3.bf16.msra.mxu1 %v540_v33 }
  0x30   :  { %545 = vmatprep.subr.bf16.mxu1 %v544_v37 }
  0x33   :  { %547 = vmatpush3.bf16.msra.mxu1 %v544_v37  ;;  %499 = vmatpush3.bf16.xpose.msra.mxu0 %v496_v36 }
  0x34   :  { %501 = vmatprep.subr.bf16.mxu0 %v500_v40  ;;  %479 = vmatprep.subr.msk.mxu1 %vm255_vm1, %v248_v51 }
  0x36   :  { %477 = vmatmul.mubr.f32.vlgmr.msra.gmra.mrb[0].mxu1 %v45_v41 }
  0x37   :  { %480 = vmatpush3.msk.msra.mxu1 %vm255_vm1, %v248_v51 }
  0x3b   :  { %503 = vmatpush3.bf16.xpose.msra.mxu0 %v500_v40 }
  0x3c   :  { %505 = vmatprep.subr.bf16.mxu0 %v504_v44 }
  0x43   :  { %507 = vmatpush3.bf16.xpose.msra.mxu0 %v504_v44 }
  0x44   :  { %509 = vmatprep.subr.bf16.mxu0 %v508_v47 }
  0x4b   :  { %511 = vmatpush3.bf16.xpose.msra.mxu0 %v508_v47 }
  0x4c   :  { %513 = vmatprep.subr.bf16.mxu0 %v512_v50 }
  0x53   :  { %515 = vmatpush3.bf16.xpose.msra.mxu0 %v512_v50 }
  0x5a   :  { %442 = vmatmul.mubr.f32.vlgmr.msra.gmra.mrb[0].mxu0 %v45_v41 }
 0x109   :  { %v478_v54 = vpop.f32.mrb[0].mxu1 }
 0x10a   :  { %v237_v55 = vadd.f32 %v478_v54, %v144_v52  ;;  %v227_v56 = vpop.f32.mrb[1].mxu1 }
 0x10b   :  { %v236_v57 = vadd.f32 %v227_v56, %v143_v53 }
 0x10c   :  { %240 = vst.msk [vmem:[#allocation3 + $0x8] sm:$0xff] %vm41_vm0, %v237_v55 }
 0x10d   :  { %239 = vst.msk [vmem:[#allocation3] sm:$0xff] %vm41_vm0, %v236_v57 }
 0x113   :  { %v245_v58 = vld [vmem:[#allocation3 + $0x8] sm:$0xff] }
 0x114   :  { %v244_v59 = vld [vmem:[#allocation3] sm:$0xff]  ;;  %v247_v61 = vmul.f32 2.0, %v245_v58 }
 0x115   :  { %v246_v60 = vmul.f32 2.0, %v244_v59 }
 0x117   :  { %481 = vmatprep.mubr.msk.f32.mxu1 %vm41_vm0, %v246_v60 }
 0x118   :  { %482 = vmatmul.mubr.msk.f32.vlgmr.msra.gmra.mrb[2].mxu1 %vm41_vm0, %v247_v61 }
 0x12d   :  { %v443_v62 = vpop.f32.mrb[0].mxu0 }
 0x12e   :  { %v130_v63 = vpop.f32.mrb[1].mxu0 }
 0x1eb   :  { %v483_v0 = vpop.f32.mrb[2].mxu1 }
 0x1ec   :  { %v548_v2 = vadd.f32 %v483_v0, %v443_v62  ;;  %v325_v3 = vpop.f32.mrb[3].mxu1 }
 0x1ed   :  { %v550_v4 = vadd.f32 %v325_v3, %v130_v63 }
 0x1ee   :  { %v549_v5 = vadd.f32 %v548_v2, %v369_v1 }
 0x1ef   :  { %v551_v6 = vadd.f32 %v550_v4, %v369_v1 }
 0x1f0   :  { %348 = vst [vmem:[#allocation7 + $0x8] sm:$0xff] %v549_v5 }
 0x1f1   :  { %347 = vst [vmem:[#allocation7] sm:$0xff] %v551_v6 }
 0x1f2   :  { %590 = shalt.err (!%p587_p12)
}
 0x1f3   :  { %s591_s2 = scalar_lea.hbm %s783_s5, 256 }
 0x1f4   :  { %p592_p13 = scmp.ne.s32.totalorder %s783_s5, %s591_s2  ;;  %p595_p0 = scmp.lt.u32.totalorder %s591_s2, %s783_s5 }
 0x1f6   :  { %p597_p1 = pnand %p595_p0, %p592_p13 }
 0x1f8   :  { %600 = shalt.err (!%p597_p1)
}
 0x1f9   :  { %360 = dma.vmem_to_hbm [thread:$0]  %s355_s24, 256, %s783_s5, [#allocation6], %s606_s28, %s606_s28, %s607_s29  }
 0x1fa   :  { %603 = dma.done.wait [#allocation6], 256  }
 0x1fb   :  { %604 = vsyncadd [#allocation6], 4294967040 }
 0x1fc   :  { %364 = vsyncpa [#allocation5], 1 }
 0x1fd   :  { %365 = vsyncpa [#allocation6], 1 }

</bundles_post_ra>
